<compile_context>
chip_gen: v7x
topology: tpu7x:2x2x1
jax: 0.10.0
libtpu: 0.0.40
codegen_flags: <defaults>
</compile_context>

<pallas_src>
import numpy as np
import jax
import jax.numpy as jnp
from jax.experimental import pallas as pl
from jax.experimental.pallas import tpu as pltpu


def _temp_embed_copy_kernel(table_ref, out_ref, sem):
    # table_ref: (max_frames, hidden) raw HBM ref (memory_space=pl.ANY)
    # out_ref:   (frames, hidden)     raw HBM ref (memory_space=pl.ANY)
    # One DMA descriptor copies the first `frames` rows HBM -> HBM.  No VMEM
    # transit, no per-step pipeline overhead, no (8,128) tiling constraints.
    frames = out_ref.shape[0]
    cp = pltpu.make_async_copy(table_ref.at[pl.ds(0, frames), :], out_ref, sem)
    cp.start()
    cp.wait()


def make_temp_embed_table(hidden_size, max_frames):
    """Replicates get_1d_sincos_temp_embed: float64 numpy math, cast to float32."""
    assert hidden_size % 2 == 0
    pos = np.arange(max_frames, dtype=np.float64)
    omega = np.arange(hidden_size // 2, dtype=np.float64) / (hidden_size / 2.0)
    omega = 1.0 / 10000 ** omega
    out = np.einsum("m,d->md", pos, omega)                    # (max_frames, H/2)
    emb = np.concatenate([np.sin(out), np.cos(out)], axis=1)  # (max_frames, H)
    return jnp.asarray(emb, dtype=jnp.float32)


def temp_embed_forward(table, frames):
    """TempEmbed.forward.

    table:  (max_frames, hidden) f32 — the precomputed sincos table.
    frames: static Python int (JAX needs static output shapes; varying frame
            counts under jit retrace/recompile per value).
    Returns (1, frames, hidden) f32, matching temp_embed_table[:, :frames, :].
    """
    max_frames, hidden = table.shape
    frames = int(frames)
    assert 0 < frames <= max_frames

    bytes_moved = 2 * frames * hidden * np.dtype(np.float32).itemsize  # read + write

    out = pl.pallas_call(
        _temp_embed_copy_kernel,
        out_shape=jax.ShapeDtypeStruct((frames, hidden), table.dtype),
        in_specs=[pl.BlockSpec(memory_space=pl.ANY)],   # leave table in HBM
        out_specs=pl.BlockSpec(memory_space=pl.ANY),    # output written directly in HBM
        scratch_shapes=[pltpu.SemaphoreType.DMA(())],
        cost_estimate=pl.CostEstimate(
            flops=0, transcendentals=0, bytes_accessed=bytes_moved),
    )(table)

    return out[None]  # add the leading batch dim -> (1, frames, hidden)


if __name__ == "__main__":
    # TempEmbed has no random inputs: its only parameter is the deterministic
    # sincos table and forward() takes a static frame count.
    _ = jax.random.PRNGKey(0)

    hidden_size = 128   # lane-aligned hidden dim
    max_frames = 100    # module default (NOT a multiple of 8 — DMA path handles it)

    table = make_temp_embed_table(hidden_size, max_frames)
    table_np = np.asarray(table)

    # Case 1: frames < max_frames.
    frames = 64
    out = temp_embed_forward(table, frames)
    jax.block_until_ready(out)
    assert out.shape == (1, frames, hidden_size)
    assert np.array_equal(np.asarray(out), table_np[None, :frames, :]), "mismatch (frames=64)"

    # Case 2: frames == max_frames == 100 (non-multiple-of-8 row count).
    out_full = temp_embed_forward(table, max_frames)
    jax.block_until_ready(out_full)
    assert out_full.shape == (1, max_frames, hidden_size)
    assert np.array_equal(np.asarray(out_full), table_np[None, :, :]), "mismatch (frames=100)"

    print("KERNEL_OK")
</pallas_src>

<mosaic_0001>
module attributes {stable_mosaic.version = 11 : i64} {
  func.func @_temp_embed_copy_kernel(%arg0: memref<100x128xf32, #tpu.memory_space<any>>, %arg1: memref<64x128xf32, #tpu.memory_space<any>>, %arg2: memref<!tpu.dma_semaphore, #tpu.memory_space<semaphore_mem>>) attributes {dimension_semantics = [], scalar_prefetch = 0 : i64, scratch_operands = 1 : i64, tpu.core_type = #tpu.core_type<tc>} {
    %c0_i32 = arith.constant 0 : i32
    %c0_i32_0 = arith.constant 0 : i32
    %0 = tpu.memref_slice %arg0[%c0_i32, %c0_i32_0] : memref<100x128xf32, #tpu.memory_space<any>> -> memref<64x128xf32, #tpu.memory_space<any>>
    tpu.enqueue_dma source(%0 : memref<64x128xf32, #tpu.memory_space<any>>) target(%arg1 : memref<64x128xf32, #tpu.memory_space<any>>) target_semaphore(%arg2 : memref<!tpu.dma_semaphore, #tpu.memory_space<semaphore_mem>>)
    %c0_i32_1 = arith.constant 0 : i32
    %c0_i32_2 = arith.constant 0 : i32
    %1 = tpu.memref_slice %arg0[%c0_i32_1, %c0_i32_2] : memref<100x128xf32, #tpu.memory_space<any>> -> memref<64x128xf32, #tpu.memory_space<any>>
    tpu.wait_dma2 semaphore(%arg2 : memref<!tpu.dma_semaphore, #tpu.memory_space<semaphore_mem>>) src(%1 : memref<64x128xf32, #tpu.memory_space<any>>) dst(%arg1 : memref<64x128xf32, #tpu.memory_space<any>>)
    return
  }
}

</mosaic_0001>

<bundles_post_ra>
// kernel: tpu_custom_call.1
= control target key start
LH: loop header
LB: loop body
LE: loop exit
PB: predicated region body
PF: predicated region fallthrough
CT: control target
= control target key end

     0   :  { %s34_s6 = smov [#allocation2]   ;;  %s35_s7 = smov [#allocation3]   ;;  %s53_s0 = inlined_call_operand.hbm [shape: f32[100,128], index: 0, kind: input, shape index: {}]   ;;  %s54_s1 = inlined_call_operand.hbm [shape: f32[64,128], index: 1, kind: output, shape index: {}]  }
   0x1   :  { %s36_s8 = smov 0  }
   0x2   :  { %18 = dma.general %s53_s0, 1024, %s54_s1, %s34_s6, %s35_s7, [#allocation4], %s36_s8, 0  }
   0x3   :  { %32 = dma.done.wait [#allocation2], 1024 }
   0x4   :  { %33 = vsyncadd [#allocation2], 4294966272 }
   0x5   :  { %22 = vsyncmov [#allocation2] }
   0x8   :  { %s23_s13 = vpop.sfrf %22 }
   0x9   :  { %p28_p0 = scmp.ne.s32.totalorder %s23_s13, 0 }
   0xb   :  { %27 = shalt.err (%p28_p0)  }

</bundles_post_ra>
